<compile_context>
chip_gen: v5e
topology: v5e:2x2
jax: 0.10.0
libtpu: 0.0.40
codegen_flags: <defaults>
</compile_context>

<pallas_src>
import jax
import jax.numpy as jnp
from jax import lax
from jax.experimental import pallas as pl
from jax.experimental.pallas import tpu as pltpu
import numpy as np

_EPS = 1e-6


def _write_head_kernel(mem_ref, wkv_ref, par_ref, rd_ref, alloc_ref,
                       out_mem_ref, out_wd_ref, out_phi_ref):
    # Shapes use BB = batch elements handled by this grid step.
    mem = mem_ref[...]                      # (BB, N, W)
    wkv = wkv_ref[...]                      # (BB, 3, W): [key, erase, write_vec]
    par = par_ref[:, 0, :]                  # (BB, P)   P = 3+R: [beta, ag, wg, fg...]
    rd = rd_ref[...]                        # (BB, R, N) prev read dists (lane-dense)
    alloc = alloc_ref[:, 0, :]              # (BB, N)   allocation dist (lane-dense)

    key = wkv[:, 0:1, :]                    # (BB, 1, W)
    erase = wkv[:, 1:2, :]                  # (BB, 1, W)
    wvec = wkv[:, 2:3, :]                   # (BB, 1, W)

    beta = par[:, 0:1]                      # (BB, 1)
    ag = par[:, 1:2]                        # (BB, 1) allocation gate
    wg = par[:, 2:3]                        # (BB, 1) write gate
    fg = par[:, 3:]                         # (BB, R) free gates

    # --- content addressing: softmax_N(beta * cosine_sim(memory, key)) ---
    # VPU multiply + lane reduce (exact f32) instead of a <0.1%-utilized MXU matmul.
    dot = jnp.sum(mem * key, axis=-1)                       # (BB, N)
    mem_sq = jnp.sum(mem * mem, axis=-1)                    # (BB, N)
    key_sq = jnp.sum(key * key, axis=-1)                    # (BB, 1)
    denom = jnp.sqrt(mem_sq * key_sq) + _EPS                # (BB, N)
    scores = beta * dot * pl.reciprocal(denom, approx=True)  # (BB, N), lane-dense
    scores = scores - jnp.max(scores, axis=-1, keepdims=True)
    num = jnp.exp(scores)
    content = num * pl.reciprocal(jnp.sum(num, axis=-1, keepdims=True), approx=True)

    # --- retention vector phi = prod_r (1 - f_r * prev_read_r) --- (BB, N)
    keep = 1.0 - fg[:, :, None] * rd                        # (BB, R, N)
    phi = keep[:, 0, :]
    for r in range(1, keep.shape[1]):                       # R is tiny & static
        phi = phi * keep[:, r, :]

    # --- write distribution --- (BB, N), lane-dense
    wd = wg * (ag * alloc + (1.0 - ag) * content)

    # --- memory update (WriteHead.mem_update, dealloc_content=True) ---
    # single lane->sublane relayout of wd/phi for the outer products (XLU, cheap)
    wd_c = wd[:, :, None]                                   # (BB, N, 1)
    phi_c = phi[:, :, None]                                 # (BB, N, 1)
    out_mem_ref[...] = mem * ((1.0 - wd_c * erase) * phi_c) + wd_c * wvec
    # lane-dense stores (N on lanes)
    out_wd_ref[...] = wd[:, None, :]                        # (BB, 1, N)
    out_phi_ref[...] = phi[:, None, :]                      # (BB, 1, N)


def _allocation_distribution(usages):
    # TODO(synk): sort/cumprod/scatter allocation weighting kept in plain JAX
    # glue (data-dependent permutation has no clean Pallas TPU equivalent).
    u = usages * (1.0 - _EPS) + _EPS
    free_list = jnp.argsort(u, axis=-1)                      # ascending
    sorted_u = jnp.take_along_axis(u, free_list, axis=-1)
    cum = jnp.cumprod(sorted_u, axis=-1)
    one_minus = 1.0 - sorted_u
    sorted_scores = jnp.concatenate(
        [one_minus[..., :1], one_minus[..., 1:] * cum[..., :-1]], axis=-1)
    b_idx = jnp.arange(usages.shape[0])[:, None]
    return jnp.zeros_like(sorted_scores).at[b_idx, free_list].set(sorted_scores)


def write_head_forward(memory, write_content_key, write_beta, erase_vector,
                       write_vector, alloc_gate, write_gate, free_gates,
                       prev_read_dist, usages=None):
    """First-step WriteHead.forward (last_write is None, fresh AllocationManager)."""
    B, N, W = memory.shape
    R = free_gates.shape[-1]
    f32 = jnp.float32
    if usages is None:                       # new_sequence(): usage counter starts at 0
        usages = jnp.zeros((B, N), f32)
    alloc_dist = _allocation_distribution(usages)            # (B, N)

    # Pack word-sized vectors into one slab and scalar params into one row:
    # 5 inputs instead of 10 -> far fewer per-step DMA setups.
    wkv = jnp.stack([write_content_key.astype(f32),
                     erase_vector.astype(f32),
                     write_vector.astype(f32)], axis=1)      # (B, 3, W)
    P = 3 + R
    params = jnp.concatenate(
        [write_beta.reshape(B, 1).astype(f32),
         alloc_gate.reshape(B, 1).astype(f32),
         write_gate.reshape(B, 1).astype(f32),
         free_gates.reshape(B, R).astype(f32)], axis=-1).reshape(B, 1, P)
    rd = prev_read_dist.astype(f32)                          # (B, R, N) — no transpose
    alloc3 = alloc_dist.reshape(B, 1, N).astype(f32)         # lane-dense

    # Whole batch in one grid step; split into 2 "parallel" steps only when the
    # batch is large & even so a v7x megacore still gets work on both cores.
    G = 2 if (B >= 4 and B % 2 == 0) else 1
    BB = B // G

    def spec(d1, d2):
        # last two block dims always equal full array dims (tiny shapes)
        return pl.BlockSpec((BB, d1, d2), lambda g: (g, 0, 0))

    in_specs = [
        spec(N, W),    # memory
        spec(3, W),    # packed [key, erase, write_vec]
        spec(1, P),    # packed [beta, alloc_gate, write_gate, free_gates]
        spec(R, N),    # prev read dists
        spec(1, N),    # allocation distribution
    ]
    out_specs = (spec(N, W), spec(1, N), spec(1, N))
    out_shape = (jax.ShapeDtypeStruct((B, N, W), f32),
                 jax.ShapeDtypeStruct((B, 1, N), f32),
                 jax.ShapeDtypeStruct((B, 1, N), f32))

    new_mem, wd, phi = pl.pallas_call(
        _write_head_kernel,
        out_shape=out_shape,
        grid=(G,),
        in_specs=in_specs,
        out_specs=out_specs,
        compiler_params=pltpu.CompilerParams(dimension_semantics=("parallel",)),
    )(memory.astype(f32), wkv, params, rd, alloc3)

    return new_mem, wd[:, 0, :], phi[:, 0, :]


def write_head_reference(memory, key, beta, erase, wvec, ag, wg, fg, prev_rd):
    """Pure-JAX reference (same math as the PyTorch module on a fresh sequence)."""
    B, N, W = memory.shape
    alloc_dist = _allocation_distribution(jnp.zeros((B, N), jnp.float32))
    dot = jnp.einsum("bnw,bw->bn", memory, key, precision=lax.Precision.HIGHEST)
    norm = jnp.linalg.norm(memory, axis=-1) * jnp.linalg.norm(key, axis=-1, keepdims=True)
    scores = beta * dot / (norm + _EPS)
    content = jax.nn.softmax(scores, axis=-1)
    phi = jnp.prod(1.0 - fg[..., None] * prev_rd, axis=1)           # (B, N)
    wd = wg * (ag * alloc_dist + (1.0 - ag) * content)              # (B, N)
    wd_e = wd[..., None]
    erase_matrix = (1.0 - wd_e * erase[:, None, :]) * phi[..., None]
    update_matrix = wd_e * wvec[:, None, :]
    return memory * erase_matrix + update_matrix, wd, phi


if __name__ == "__main__":
    B, N, W, R = 2, 16, 32, 2
    root = jax.random.PRNGKey(0)
    ks = jax.random.split(root, 9)
    memory = jax.random.normal(ks[0], (B, N, W), jnp.float32)
    write_key = jax.random.normal(ks[1], (B, W), jnp.float32)
    write_beta = 1.0 + jax.nn.softplus(jax.random.normal(ks[2], (B, 1), jnp.float32))
    erase_vec = jax.nn.sigmoid(jax.random.normal(ks[3], (B, W), jnp.float32))
    write_vec = jax.random.normal(ks[4], (B, W), jnp.float32)
    alloc_gate = jax.nn.sigmoid(jax.random.normal(ks[5], (B, 1), jnp.float32))
    write_gate = jax.nn.sigmoid(jax.random.normal(ks[6], (B, 1), jnp.float32))
    free_gates = jax.nn.sigmoid(jax.random.normal(ks[7], (B, R), jnp.float32))
    prev_read_dist = jax.nn.softmax(
        jax.random.normal(ks[8], (B, R, N), jnp.float32), axis=-1)

    new_mem, wd, phi = write_head_forward(
        memory, write_key, write_beta, erase_vec, write_vec,
        alloc_gate, write_gate, free_gates, prev_read_dist)
    jax.block_until_ready(new_mem)

    ref_mem, ref_wd, ref_phi = write_head_reference(
        memory, write_key, write_beta, erase_vec, write_vec,
        alloc_gate, write_gate, free_gates, prev_read_dist)

    np.testing.assert_allclose(np.asarray(new_mem), np.asarray(ref_mem), rtol=2e-3, atol=2e-3)
    np.testing.assert_allclose(np.asarray(wd), np.asarray(ref_wd), rtol=2e-3, atol=2e-3)
    np.testing.assert_allclose(np.asarray(phi), np.asarray(ref_phi), rtol=2e-3, atol=2e-3)
    print("KERNEL_OK")
</pallas_src>

<mosaic_0001>
module attributes {stable_mosaic.version = 11 : i64} {
  func.func @_write_head_kernel(%arg0: i32, %arg1: memref<2x16x32xf32, #tpu.memory_space<vmem>>, %arg2: memref<2x3x32xf32, #tpu.memory_space<vmem>>, %arg3: memref<2x1x5xf32, #tpu.memory_space<vmem>>, %arg4: memref<2x2x16xf32, #tpu.memory_space<vmem>>, %arg5: memref<2x1x16xf32, #tpu.memory_space<vmem>>, %arg6: memref<2x16x32xf32, #tpu.memory_space<vmem>>, %arg7: memref<2x1x16xf32, #tpu.memory_space<vmem>>, %arg8: memref<2x1x16xf32, #tpu.memory_space<vmem>>) attributes {dimension_semantics = [#tpu.dimension_semantics<parallel>], iteration_bounds = array<i64: 1>, scalar_prefetch = 0 : i64, scratch_operands = 0 : i64, tpu.core_type = #tpu.core_type<tc>, window_params = [{transform_indices = @transform_0, window_bounds = array<i64: 2, 16, 32>}, {transform_indices = @transform_1, window_bounds = array<i64: 2, 3, 32>}, {transform_indices = @transform_2, window_bounds = array<i64: 2, 1, 5>}, {transform_indices = @transform_3, window_bounds = array<i64: 2, 2, 16>}, {transform_indices = @transform_4, window_bounds = array<i64: 2, 1, 16>}, {transform_indices = @transform_5, window_bounds = array<i64: 2, 16, 32>}, {transform_indices = @transform_6, window_bounds = array<i64: 2, 1, 16>}, {transform_indices = @transform_7, window_bounds = array<i64: 2, 1, 16>}]} {
    %c0 = arith.constant 0 : index
    %c0_0 = arith.constant 0 : index
    %c0_1 = arith.constant 0 : index
    %0 = vector.load %arg1[%c0, %c0_0, %c0_1] : memref<2x16x32xf32, #tpu.memory_space<vmem>>, vector<2x16x32xf32>
    %c0_2 = arith.constant 0 : index
    %c0_3 = arith.constant 0 : index
    %c0_4 = arith.constant 0 : index
    %1 = vector.load %arg2[%c0_2, %c0_3, %c0_4] : memref<2x3x32xf32, #tpu.memory_space<vmem>>, vector<2x3x32xf32>
    %c0_5 = arith.constant 0 : index
    %c0_6 = arith.constant 0 : index
    %c0_7 = arith.constant 0 : index
    %2 = vector.load %arg3[%c0_5, %c0_6, %c0_7] : memref<2x1x5xf32, #tpu.memory_space<vmem>>, vector<2x1x5xf32>
    %3 = vector.shape_cast %2 : vector<2x1x5xf32> to vector<2x5xf32>
    %c0_8 = arith.constant 0 : index
    %c0_9 = arith.constant 0 : index
    %c0_10 = arith.constant 0 : index
    %4 = vector.load %arg4[%c0_8, %c0_9, %c0_10] : memref<2x2x16xf32, #tpu.memory_space<vmem>>, vector<2x2x16xf32>
    %c0_11 = arith.constant 0 : index
    %c0_12 = arith.constant 0 : index
    %c0_13 = arith.constant 0 : index
    %5 = vector.load %arg5[%c0_11, %c0_12, %c0_13] : memref<2x1x16xf32, #tpu.memory_space<vmem>>, vector<2x1x16xf32>
    %6 = vector.shape_cast %5 : vector<2x1x16xf32> to vector<2x16xf32>
    %7 = vector.extract_strided_slice %1 {offsets = [0, 0, 0], sizes = [2, 1, 32], strides = [1, 1, 1]} : vector<2x3x32xf32> to vector<2x1x32xf32>
    %8 = vector.extract_strided_slice %1 {offsets = [0, 1, 0], sizes = [2, 1, 32], strides = [1, 1, 1]} : vector<2x3x32xf32> to vector<2x1x32xf32>
    %9 = vector.extract_strided_slice %1 {offsets = [0, 2, 0], sizes = [2, 1, 32], strides = [1, 1, 1]} : vector<2x3x32xf32> to vector<2x1x32xf32>
    %10 = vector.extract_strided_slice %3 {offsets = [0, 0], sizes = [2, 1], strides = [1, 1]} : vector<2x5xf32> to vector<2x1xf32>
    %11 = vector.extract_strided_slice %3 {offsets = [0, 1], sizes = [2, 1], strides = [1, 1]} : vector<2x5xf32> to vector<2x1xf32>
    %12 = vector.extract_strided_slice %3 {offsets = [0, 2], sizes = [2, 1], strides = [1, 1]} : vector<2x5xf32> to vector<2x1xf32>
    %13 = vector.extract_strided_slice %3 {offsets = [0, 3], sizes = [2, 2], strides = [1, 1]} : vector<2x5xf32> to vector<2x2xf32>
    %14 = vector.broadcast %7 : vector<2x1x32xf32> to vector<2x16x32xf32>
    %15 = arith.mulf %0, %14 : vector<2x16x32xf32>
    %cst = arith.constant dense<0.000000e+00> : vector<2x16xf32>
    %16 = vector.multi_reduction <add>, %15, %cst [2] : vector<2x16x32xf32> to vector<2x16xf32>
    %17 = arith.mulf %0, %0 : vector<2x16x32xf32>
    %cst_14 = arith.constant dense<0.000000e+00> : vector<2x16xf32>
    %18 = vector.multi_reduction <add>, %17, %cst_14 [2] : vector<2x16x32xf32> to vector<2x16xf32>
    %19 = arith.mulf %7, %7 : vector<2x1x32xf32>
    %cst_15 = arith.constant dense<0.000000e+00> : vector<2x1xf32>
    %20 = vector.multi_reduction <add>, %19, %cst_15 [2] : vector<2x1x32xf32> to vector<2x1xf32>
    %21 = vector.broadcast %20 : vector<2x1xf32> to vector<2x16xf32>
    %22 = arith.mulf %18, %21 : vector<2x16xf32>
    %23 = math.sqrt %22 : vector<2x16xf32>
    %cst_16 = arith.constant 9.99999997E-7 : f32
    %24 = vector.broadcast %cst_16 : f32 to vector<2x16xf32>
    %25 = arith.addf %23, %24 : vector<2x16xf32>
    %26 = vector.broadcast %10 : vector<2x1xf32> to vector<2x16xf32>
    %27 = arith.mulf %26, %16 : vector<2x16xf32>
    %28 = tpu.reciprocal %25 {approx = true} : vector<2x16xf32> -> vector<2x16xf32>
    %29 = arith.mulf %27, %28 : vector<2x16xf32>
    %cst_17 = arith.constant dense<0xFF800000> : vector<2xf32>
    %30 = vector.multi_reduction <maximumf>, %29, %cst_17 [1] : vector<2x16xf32> to vector<2xf32>
    %31 = vector.shape_cast %30 : vector<2xf32> to vector<2x1xf32>
    %32 = vector.broadcast %31 : vector<2x1xf32> to vector<2x16xf32>
    %33 = arith.subf %29, %32 : vector<2x16xf32>
    %34 = math.exp %33 : vector<2x16xf32>
    %cst_18 = arith.constant dense<0.000000e+00> : vector<2xf32>
    %35 = vector.multi_reduction <add>, %34, %cst_18 [1] : vector<2x16xf32> to vector<2xf32>
    %36 = vector.shape_cast %35 : vector<2xf32> to vector<2x1xf32>
    %37 = tpu.reciprocal %36 {approx = true} : vector<2x1xf32> -> vector<2x1xf32>
    %38 = vector.broadcast %37 : vector<2x1xf32> to vector<2x16xf32>
    %39 = arith.mulf %34, %38 : vector<2x16xf32>
    %40 = vector.shape_cast %13 : vector<2x2xf32> to vector<2x2x1xf32>
    %41 = vector.broadcast %40 : vector<2x2x1xf32> to vector<2x2x16xf32>
    %42 = arith.mulf %41, %4 : vector<2x2x16xf32>
    %cst_19 = arith.constant 1.000000e+00 : f32
    %43 = vector.broadcast %cst_19 : f32 to vector<2x2x16xf32>
    %44 = arith.subf %43, %42 : vector<2x2x16xf32>
    %45 = vector.extract_strided_slice %44 {offsets = [0, 0, 0], sizes = [2, 1, 16], strides = [1, 1, 1]} : vector<2x2x16xf32> to vector<2x1x16xf32>
    %46 = vector.shape_cast %45 : vector<2x1x16xf32> to vector<2x16xf32>
    %47 = vector.extract_strided_slice %44 {offsets = [0, 1, 0], sizes = [2, 1, 16], strides = [1, 1, 1]} : vector<2x2x16xf32> to vector<2x1x16xf32>
    %48 = vector.shape_cast %47 : vector<2x1x16xf32> to vector<2x16xf32>
    %49 = arith.mulf %46, %48 : vector<2x16xf32>
    %50 = vector.broadcast %11 : vector<2x1xf32> to vector<2x16xf32>
    %51 = arith.mulf %50, %6 : vector<2x16xf32>
    %cst_20 = arith.constant 1.000000e+00 : f32
    %52 = vector.broadcast %cst_20 : f32 to vector<2x1xf32>
    %53 = arith.subf %52, %11 : vector<2x1xf32>
    %54 = vector.broadcast %53 : vector<2x1xf32> to vector<2x16xf32>
    %55 = arith.mulf %54, %39 : vector<2x16xf32>
    %56 = arith.addf %51, %55 : vector<2x16xf32>
    %57 = vector.broadcast %12 : vector<2x1xf32> to vector<2x16xf32>
    %58 = arith.mulf %57, %56 : vector<2x16xf32>
    %59 = vector.shape_cast %58 : vector<2x16xf32> to vector<2x16x1xf32>
    %60 = vector.shape_cast %49 : vector<2x16xf32> to vector<2x16x1xf32>
    %61 = vector.broadcast %59 : vector<2x16x1xf32> to vector<2x16x32xf32>
    %62 = vector.broadcast %8 : vector<2x1x32xf32> to vector<2x16x32xf32>
    %63 = arith.mulf %61, %62 : vector<2x16x32xf32>
    %cst_21 = arith.constant 1.000000e+00 : f32
    %64 = vector.broadcast %cst_21 : f32 to vector<2x16x32xf32>
    %65 = arith.subf %64, %63 : vector<2x16x32xf32>
    %66 = vector.broadcast %60 : vector<2x16x1xf32> to vector<2x16x32xf32>
    %67 = arith.mulf %65, %66 : vector<2x16x32xf32>
    %68 = arith.mulf %0, %67 : vector<2x16x32xf32>
    %69 = vector.broadcast %59 : vector<2x16x1xf32> to vector<2x16x32xf32>
    %70 = vector.broadcast %9 : vector<2x1x32xf32> to vector<2x16x32xf32>
    %71 = arith.mulf %69, %70 : vector<2x16x32xf32>
    %72 = arith.addf %68, %71 : vector<2x16x32xf32>
    %c0_22 = arith.constant 0 : index
    %c0_23 = arith.constant 0 : index
    %c0_24 = arith.constant 0 : index
    %73 = vector.load %arg6[%c0_22, %c0_23, %c0_24] : memref<2x16x32xf32, #tpu.memory_space<vmem>>, vector<2x16x32xf32>
    tpu.vector_store %arg6[%c0_22, %c0_23, %c0_24], %72 {strides = array<i32>} : memref<2x16x32xf32, #tpu.memory_space<vmem>>, vector<2x16x32xf32>,
    %74 = vector.shape_cast %58 : vector<2x16xf32> to vector<2x1x16xf32>
    %c0_25 = arith.constant 0 : index
    %c0_26 = arith.constant 0 : index
    %c0_27 = arith.constant 0 : index
    %75 = vector.load %arg7[%c0_25, %c0_26, %c0_27] : memref<2x1x16xf32, #tpu.memory_space<vmem>>, vector<2x1x16xf32>
    tpu.vector_store %arg7[%c0_25, %c0_26, %c0_27], %74 {strides = array<i32>} : memref<2x1x16xf32, #tpu.memory_space<vmem>>, vector<2x1x16xf32>,
    %76 = vector.shape_cast %49 : vector<2x16xf32> to vector<2x1x16xf32>
    %c0_28 = arith.constant 0 : index
    %c0_29 = arith.constant 0 : index
    %c0_30 = arith.constant 0 : index
    %77 = vector.load %arg8[%c0_28, %c0_29, %c0_30] : memref<2x1x16xf32, #tpu.memory_space<vmem>>, vector<2x1x16xf32>
    tpu.vector_store %arg8[%c0_28, %c0_29, %c0_30], %76 {strides = array<i32>} : memref<2x1x16xf32, #tpu.memory_space<vmem>>, vector<2x1x16xf32>,
    return
  }
  func.func @transform_0(%arg0: i32) -> (i32, i32, i32) {
    %c0_i32 = arith.constant 0 : i32
    %c0_i32_0 = arith.constant 0 : i32
    %c0_i32_1 = arith.constant 0 : i32
    return %arg0, %c0_i32, %c0_i32_0 : i32, i32, i32
  }
  func.func @transform_1(%arg0: i32) -> (i32, i32, i32) {
    %c0_i32 = arith.constant 0 : i32
    %c0_i32_0 = arith.constant 0 : i32
    %c0_i32_1 = arith.constant 0 : i32
    return %arg0, %c0_i32, %c0_i32_0 : i32, i32, i32
  }
  func.func @transform_2(%arg0: i32) -> (i32, i32, i32) {
    %c0_i32 = arith.constant 0 : i32
    %c0_i32_0 = arith.constant 0 : i32
    %c0_i32_1 = arith.constant 0 : i32
    return %arg0, %c0_i32, %c0_i32_0 : i32, i32, i32
  }
  func.func @transform_3(%arg0: i32) -> (i32, i32, i32) {
    %c0_i32 = arith.constant 0 : i32
    %c0_i32_0 = arith.constant 0 : i32
    %c0_i32_1 = arith.constant 0 : i32
    return %arg0, %c0_i32, %c0_i32_0 : i32, i32, i32
  }
  func.func @transform_4(%arg0: i32) -> (i32, i32, i32) {
    %c0_i32 = arith.constant 0 : i32
    %c0_i32_0 = arith.constant 0 : i32
    %c0_i32_1 = arith.constant 0 : i32
    return %arg0, %c0_i32, %c0_i32_0 : i32, i32, i32
  }
  func.func @transform_5(%arg0: i32) -> (i32, i32, i32) {
    %c0_i32 = arith.constant 0 : i32
    %c0_i32_0 = arith.constant 0 : i32
    %c0_i32_1 = arith.constant 0 : i32
    return %arg0, %c0_i32, %c0_i32_0 : i32, i32, i32
  }
  func.func @transform_6(%arg0: i32) -> (i32, i32, i32) {
    %c0_i32 = arith.constant 0 : i32
    %c0_i32_0 = arith.constant 0 : i32
    %c0_i32_1 = arith.constant 0 : i32
    return %arg0, %c0_i32, %c0_i32_0 : i32, i32, i32
  }
  func.func @transform_7(%arg0: i32) -> (i32, i32, i32) {
    %c0_i32 = arith.constant 0 : i32
    %c0_i32_0 = arith.constant 0 : i32
    %c0_i32_1 = arith.constant 0 : i32
    return %arg0, %c0_i32, %c0_i32_0 : i32, i32, i32
  }
}

</mosaic_0001>

<bundles_post_ra>
// kernel: tpu_custom_call.1
= control target key start
LH: loop header
LB: loop body
LE: loop exit
PB: predicated region body
PF: predicated region fallthrough
CT: control target
= control target key end

     0   :  { %13 = vsyncpa [#allocation3], 0  ;;  %s1006_s0 = inlined_call_operand.hbm [shape: f32[2,16,32], index: 0, kind: input, shape index: {}]   ;;  %s1007_s1 = inlined_call_operand.vmem [shape: f32[2,3,32], index: 1, kind: input, shape index: {}]   ;;  %s1008_s2 = inlined_call_operand.vmem [shape: f32[2,1,5], index: 2, kind: input, shape index: {}]   ;;  %s1009_s3 = inlined_call_operand.vmem [shape: f32[2,2,16], index: 3, kind: input, shape index: {}]   ;;  %s1010_s4 = inlined_call_operand.vmem [shape: f32[2,1,16], index: 4, kind: input, shape index: {}]   ;;  %s1011_s5 = inlined_call_operand.hbm [shape: f32[2,16,32], index: 5, kind: output, shape index: {0}]   ;;  %s1012_s6 = inlined_call_operand.hbm [shape: f32[2,1,16], index: 6, kind: output, shape index: {1}]   ;;  %s1013_s7 = inlined_call_operand.hbm [shape: f32[2,1,16], index: 7, kind: output, shape index: {2}]  }
   0x1   :  { %14 = vsyncpa [#allocation4], 0 }
   0x2   :  { %15 = vsyncpa [#allocation7], 0  ;;  %s20_s26 = sshll.u32 %s1006_s0, 4  ;;  %s789_s27 = smov [#allocation2]   ;;  %s21_s26 = int_to_ptr.hbm [resolvable:$true] %s20_s26 }
   0x3   :  { %s22_s28 = sshll.u32 %s789_s27, 4  ;;  %s790_s29 = smov 128   ;;  %s23_s28 = int_to_ptr.vmem [resolvable:$true] %s22_s28 }
   0x4   :  { %s791_s30 = smov 8  }
   0x5   :  { %28 = dma.hbm_to_vmem [thread:$0]  %s21_s26, 512, %s23_s28, [#allocation3], %s790_s29, %s790_s29, %s791_s30  }
   0x6   :  { %783 = dma.done.wait [#allocation3], 512  }
   0x7   :  { %784 = vsyncadd [#allocation3], 4294966784  ;;  %v849_v0 = vld [vmem:[%s1007_s1] sm:$0x7]  ;;  %vm90_vm0 = vcmask 253952   ;;  %v851_v1 = vld [vmem:[#allocation2] sm:$0xff] }
   0x8   :  { %vm59_vm1 = vcmask 261120   ;;  %v853_v2 = vld [vmem:[#allocation2 + $0x8] sm:$0xff]  ;;  %v88_v3 = vmul.f32 %v849_v0, %v849_v0  ;;  %v72_v4 = vmul.f32 %v851_v1, %v851_v1  ;;  %v53_v6 = vperm.slane %v849_v0, 0  ;;  %v868_v10 = vld [vmem:[%s1007_s1 + $0x4] sm:$0x7]  ;;  %v878_v18 = vld [vmem:[#allocation2 + $0x10] sm:$0xff] }
   0x9   :  { %v73_v5 = vmul.f32 %v853_v2, %v853_v2  ;;  %v89_v13 = vmul.f32 %v868_v10, %v868_v10  ;;  %v54_v16 = vperm.slane %v868_v10, 0  ;;  %v74_v19 = vmul.f32 %v878_v18, %v878_v18  ;;  %v883_v21 = vld [vmem:[#allocation2 + $0x18] sm:$0xff]  ;;  %s605_s21 = sshll.u32 %s1012_s6, 4  ;;  %s795_s22 = smov [#allocation6]   ;;  %s606_s21 = int_to_ptr.hbm [resolvable:$true] %s605_s21 }
   0xa   :  { %v91_v7 = vsel %vm90_vm0, %v88_v3, 0.0  ;;  %v76_v8 = vsel %vm59_vm1, %v72_v4, 0.0  ;;  %v56_v11 = vmul.f32 %v53_v6, %v853_v2  ;;  %v55_v12 = vmul.f32 %v53_v6, %v851_v1  ;;  %s603_s23 = sshll.u32 %s795_s22, 4  ;;  %s796_s24 = smov 16   ;;  %s604_s23 = int_to_ptr.vmem [resolvable:$true] %s603_s23 }
   0xb   :  { %v79_v9 = vsel %vm59_vm1, %v73_v5, 0.0  ;;  %92 = vadd.xlane.f32.xlu0 %v91_v7  ;;  %77 = vadd.xlane.f32.xlu1 %v76_v8  ;;  %v94_v17 = vsel %vm90_vm0, %v89_v13, 0.0  ;;  %v57_v20 = vmul.f32 %v54_v16, %v878_v18  ;;  %v58_v22 = vmul.f32 %v54_v16, %v883_v21  ;;  %s797_s25 = smov 1   ;;  %s618_s28 = sshll.u32 %s1013_s7, 4  ;;  %s619_s28 = int_to_ptr.hbm [resolvable:$true] %s618_s28 }
   0xc   :  { %80 = vadd.xlane.f32.xlu2 %v79_v9  ;;  %v63_v14 = vsel %vm59_vm1, %v56_v11, 0.0  ;;  %v60_v15 = vsel %vm59_vm1, %v55_v12, 0.0  ;;  %v82_v23 = vsel %vm59_vm1, %v74_v19, 0.0  ;;  %v75_v26 = vmul.f32 %v883_v21, %v883_v21  ;;  %s798_s8 = smov [#allocation8]   ;;  %s799_s6 = smov [#allocation5]  }
   0xd   :  { %v66_v24 = vsel %vm59_vm1, %v57_v20, 0.0  ;;  %v69_v25 = vsel %vm59_vm1, %v58_v22, 0.0  ;;  %v792_v30 = vmov 0   ;;  %vm263_vm10 = vcmask 130112   ;;  %s616_s9 = sshll.u32 %s798_s8, 4  ;;  %s590_s7 = sshll.u32 %s799_s6, 4  ;;  %s617_s9 = int_to_ptr.vmem [resolvable:$true] %s616_s9  ;;  %s591_s7 = int_to_ptr.vmem [resolvable:$true] %s590_s7 }
   0xe   :  { %v85_v27 = vsel %vm59_vm1, %v75_v26, 0.0  ;;  %651 = vset.pattern.permute.xlu1 %v792_v30  ;;  %652 = vset.pattern.permute.xlu2 %v792_v30  ;;  %vm268_vm11 = vcmask 1041409   ;;  %vm389_vm12 = vcmask 123904   ;;  %vm581_vm13 = vcmask 122880   ;;  %s592_s1 = sshll.u32 %s1011_s5, 4  ;;  %s593_s1 = int_to_ptr.hbm [resolvable:$true] %s592_s1 }
   0xf   :  { %653 = vset.pattern.permute.xlu0 %v792_v30 }
  0x13   :  { %64 = vadd.xlane.f32.xlu1 %v63_v14  ;;  %61 = vadd.xlane.f32.xlu0 %v60_v15 }
  0x14   :  { %95 = vadd.xlane.f32.xlu2 %v94_v17 }
  0x1b   :  { %83 = vadd.xlane.f32.xlu1 %v82_v23  ;;  %67 = vadd.xlane.f32.xlu0 %v66_v24 }
  0x1c   :  { %70 = vadd.xlane.f32.xlu2 %v69_v25 }
  0x23   :  { %86 = vadd.xlane.f32.xlu0 %v85_v27 }
  0x7e   :  { %v93_v28 = vpop.xlane.xlu0 %92  ;;  %v78_v36 = vpop.xlane.xlu1 %77 }
  0x7f   :  { %v97_v31 = vperm.slane %v93_v28, 0  ;;  %v81_v47 = vpop.xlane.xlu2 %80 }
  0x81   :  { %v892_v39 = vmul.f32 %v97_v31, %v78_v36  ;;  %v896_v53 = vmul.f32 %v97_v31, %v81_v47 }
  0x83   :  { %665 = vrsqrt.f32 %v892_v39  ;;  %vm110_vm2 = vcmp.eq.f32.partialorder %v892_v39, inf  ;;  %v113_v23 = vand.u32 2147483648, %v892_v39  ;;  %vm112_vm3 = vcmp.eq.f32.partialorder %v892_v39, 0.0 }
  0x84   :  { %667 = vrsqrt.f32 %v896_v53  ;;  %vm122_vm4 = vcmp.eq.f32.partialorder %v896_v53, inf  ;;  %v125_v47 = vand.u32 2147483648, %v896_v53  ;;  %vm124_vm5 = vcmp.eq.f32.partialorder %v896_v53, 0.0 }
  0x86   :  { %v62_v29 = vpop.xlane.xlu0 %61  ;;  %v65_v42 = vpop.xlane.xlu1 %64 }
  0x87   :  { %v171_v32 = vperm.slane %v62_v29, 0  ;;  %v172_v33 = vperm.slane %v62_v29, 1  ;;  %v173_v34 = vperm.slane %v62_v29, 2  ;;  %v174_v35 = vperm.slane %v62_v29, 3  ;;  %v96_v58 = vpop.xlane.xlu2 %95 }
  0x88   :  { %v175_v37 = vperm.slane %v62_v29, 4  ;;  %v176_v38 = vperm.slane %v62_v29, 5  ;;  %v177_v40 = vperm.slane %v62_v29, 6  ;;  %v178_v41 = vperm.slane %v62_v29, 7 }
  0x89   :  { %203 = vst [vmem:[#allocation1] ss:$9 sm:$0xff] %v171_v32  ;;  %v179_v43 = vperm.slane %v65_v42, 0  ;;  %v666_v44 = vpop.eup %665  ;;  %v180_v45 = vperm.slane %v65_v42, 1  ;;  %v181_v46 = vperm.slane %v65_v42, 2  ;;  %v182_v48 = vperm.slane %v65_v42, 3 }
  0x8a   :  { %205 = vst [vmem:[#allocation1 + $0x1] ss:$9 sm:$0xff] %v172_v33  ;;  %v104_v50 = vmul.f32 %v666_v44, %v892_v39  ;;  %v183_v51 = vperm.slane %v65_v42, 4  ;;  %v184_v52 = vperm.slane %v65_v42, 5  ;;  %v185_v54 = vperm.slane %v65_v42, 6  ;;  %v668_v61 = vpop.eup %667 }
  0x8b   :  { %207 = vst [vmem:[#allocation1 + $0x2] ss:$9 sm:$0xff] %v173_v34  ;;  %v186_v55 = vperm.slane %v65_v42, 7  ;;  %v98_v3 = vperm.slane %v96_v58, 0  ;;  %v116_v8 = vmul.f32 %v668_v61, %v896_v53 }
  0x8c   :  { %209 = vst [vmem:[#allocation1 + $0x3] ss:$9 sm:$0xff] %v174_v35  ;;  %v105_v56 = vmul.f32 %v666_v44, %v104_v50 }
  0x8d   :  { %211 = vst [vmem:[#allocation1 + $0x4] ss:$9 sm:$0xff] %v175_v37  ;;  %v117_v16 = vmul.f32 %v668_v61, %v116_v8 }
  0x8e   :  { %213 = vst [vmem:[#allocation1 + $0x5] ss:$9 sm:$0xff] %v176_v38  ;;  %v106_v57 = vmul.f32 0.5, %v105_v56  ;;  %v68_v59 = vpop.xlane.xlu0 %67  ;;  %v84_v6 = vpop.xlane.xlu1 %83 }
  0x8f   :  { %215 = vst [vmem:[#allocation1 + $0x6] ss:$9 sm:$0xff] %v177_v40  ;;  %v187_v60 = vperm.slane %v68_v59, 0  ;;  %v188_v63 = vperm.slane %v68_v59, 1  ;;  %v189_v4 = vperm.slane %v68_v59, 2  ;;  %v190_v7 = vperm.slane %v68_v59, 3  ;;  %v71_v20 = vpop.xlane.xlu2 %70 }
  0x90   :  { %217 = vst [vmem:[#allocation1 + $0x7] ss:$9 sm:$0xff] %v178_v41  ;;  %v107_v62 = vsub.f32 1.5, %v106_v57  ;;  %v191_v9 = vperm.slane %v68_v59, 4  ;;  %v192_v12 = vperm.slane %v68_v59, 5  ;;  %v900_v13 = vmul.f32 %v98_v3, %v84_v6 }
  0x91   :  { %v193_v14 = vperm.slane %v68_v59, 6  ;;  %v194_v15 = vperm.slane %v68_v59, 7  ;;  %v118_v19 = vmul.f32 0.5, %v117_v16  ;;  %v195_v24 = vperm.slane %v71_v20, 0 }
  0x92   :  { %v108_v11 = vmul.f32 %v666_v44, %v107_v62  ;;  %669 = vrsqrt.f32 %v900_v13  ;;  %v196_v28 = vperm.slane %v71_v20, 1  ;;  %v197_v29 = vperm.slane %v71_v20, 2 }
  0x93   :  { %v119_v27 = vsub.f32 1.5, %v118_v19  ;;  %v198_v32 = vperm.slane %v71_v20, 3  ;;  %v199_v35 = vperm.slane %v71_v20, 4  ;;  %v200_v37 = vperm.slane %v71_v20, 5 }
  0x94   :  { %v109_v17 = vmul.f32 %v108_v11, %v892_v39  ;;  %v202_v40 = vperm.slane %v71_v20, 7  ;;  %vm134_vm6 = vcmp.eq.f32.partialorder %v900_v13, inf  ;;  %vm136_vm7 = vcmp.eq.f32.partialorder %v900_v13, 0.0 }
  0x95   :  { %v120_v36 = vmul.f32 %v668_v61, %v119_v27 }
  0x96   :  { %v111_v22 = vsel %vm110_vm2, %v892_v39, %v109_v17  ;;  %v87_v31 = vpop.xlane.xlu0 %86  ;;  %v201_v39 = vperm.slane %v71_v20, 6 }
  0x97   :  { %v218_v49 = vld [vmem:[#allocation1] sm:$0xff]  ;;  %v114_v26 = vsel %vm112_vm3, %v113_v23, %v111_v22  ;;  %v909_v38 = vmul.f32 %v98_v3, %v87_v31  ;;  %v121_v42 = vmul.f32 %v120_v36, %v896_v53 }
  0x98   :  { %219 = vst [vmem:[#allocation1] ss:$9 sm:$0xff] %v179_v43  ;;  %247 = vperm.xlu1 %651, %v218_v49   ;;  %v670_v25 = vpop.eup %669  ;;  %v151_v33 = vadd.f32 1e-06, %v114_v26  ;;  %v915_v43 = vld [vmem:[%s1008_s2 + $0x1] sm:$0x1] }
  0x99   :  { %220 = vst [vmem:[#allocation1 + $0x1] ss:$9 sm:$0xff] %v180_v45  ;;  %v128_v34 = vmul.f32 %v670_v25, %v900_v13  ;;  %v123_v45 = vsel %vm122_vm4, %v896_v53, %v121_v42  ;;  %vm146_vm8 = vcmp.eq.f32.partialorder %v909_v38, inf  ;;  %v149_v27 = vand.u32 2147483648, %v909_v38 }
  0x9a   :  { %221 = vst [vmem:[#allocation1 + $0x2] ss:$9 sm:$0xff] %v181_v46  ;;  %671 = vrcp.f32 %v151_v33  ;;  %v126_v49 = vsel %vm124_vm5, %v125_v47, %v123_v45  ;;  %vm148_vm9 = vcmp.eq.f32.partialorder %v909_v38, 0.0 }
  0x9b   :  { %222 = vst [vmem:[#allocation1 + $0x3] ss:$9 sm:$0xff] %v182_v48  ;;  %v129_v41 = vmul.f32 %v670_v25, %v128_v34  ;;  %673 = vrsqrt.f32 %v909_v38 }
  0x9c   :  { %223 = vst [vmem:[#allocation1 + $0x4] ss:$9 sm:$0xff] %v183_v51 }
  0x9d   :  { %224 = vst [vmem:[#allocation1 + $0x5] ss:$9 sm:$0xff] %v184_v52  ;;  %v130_v44 = vmul.f32 0.5, %v129_v41 }
  0x9e   :  { %225 = vst [vmem:[#allocation1 + $0x6] ss:$9 sm:$0xff] %v185_v54 }
  0x9f   :  { %226 = vst [vmem:[#allocation1 + $0x7] ss:$9 sm:$0xff] %v186_v55  ;;  %v131_v50 = vsub.f32 1.5, %v130_v44  ;;  %v152_v55 = vadd.f32 1e-06, %v126_v49 }
  0xa0   :  { %v672_v46 = vpop.eup %671  ;;  %v937_v49 = vld [vmem:[%s1008_s2] sm:$0x1] }
  0xa1   :  { %v674_v48 = vpop.eup %673  ;;  %v283_v51 = vperm.slane %v672_v46, 0  ;;  %v284_v54 = vperm.slane %v672_v46, 1  ;;  %v285_v57 = vperm.slane %v672_v46, 2  ;;  %v132_v58 = vmul.f32 %v670_v25, %v131_v50 }
  0xa2   :  { %v140_v56 = vmul.f32 %v674_v48, %v909_v38  ;;  %v286_v59 = vperm.slane %v672_v46, 3  ;;  %v288_v61 = vperm.slane %v672_v46, 5  ;;  %675 = vrcp.f32 %v152_v55 }
  0xa3   :  { %v289_v62 = vperm.slane %v672_v46, 6  ;;  %v290_v3 = vperm.slane %v672_v46, 7 }
  0xa4   :  { %v141_v53 = vmul.f32 %v674_v48, %v140_v56  ;;  %v258_v56 = vlaneseq }
  0xa6   :  { %v227_v5 = vld [vmem:[#allocation1] sm:$0xff] }
  0xa7   :  { %228 = vst [vmem:[#allocation1] ss:$9 sm:$0xff] %v187_v60  ;;  %250 = vperm.xlu2 %652, %v227_v5   ;;  %v287_v60 = vperm.slane %v672_v46, 4 }
  0xa8   :  { %229 = vst [vmem:[#allocation1 + $0x1] ss:$9 sm:$0xff] %v188_v63  ;;  %v133_v63 = vmul.f32 %v132_v58, %v900_v13  ;;  %v676_v6 = vpop.eup %675  ;;  %v259_v58 = vand.u32 127, %v258_v56 }
  0xa9   :  { %230 = vst [vmem:[#allocation1 + $0x2] ss:$9 sm:$0xff] %v189_v4  ;;  %v142_v4 = vmul.f32 0.5, %v141_v53  ;;  %v291_v11 = vperm.slane %v676_v6, 0  ;;  %v293_v16 = vperm.slane %v676_v6, 2  ;;  %v294_v19 = vperm.slane %v676_v6, 3 }
  0xaa   :  { %231 = vst [vmem:[#allocation1 + $0x3] ss:$9 sm:$0xff] %v190_v7  ;;  %v135_v5 = vsel %vm134_vm6, %v900_v13, %v133_v63  ;;  %v137_v7 = vand.u32 2147483648, %v900_v13  ;;  %v295_v20 = vperm.slane %v676_v6, 4  ;;  %v296_v22 = vperm.slane %v676_v6, 5 }
  0xab   :  { %232 = vst [vmem:[#allocation1 + $0x4] ss:$9 sm:$0xff] %v191_v9  ;;  %v143_v9 = vsub.f32 1.5, %v142_v4  ;;  %v297_v23 = vperm.slane %v676_v6, 6 }
  0xac   :  { %233 = vst [vmem:[#allocation1 + $0x5] ss:$9 sm:$0xff] %v192_v12  ;;  %v138_v8 = vsel %vm136_vm7, %v137_v7, %v135_v5  ;;  %v292_v12 = vperm.slane %v676_v6, 1 }
  0xad   :  { %234 = vst [vmem:[#allocation1 + $0x6] ss:$9 sm:$0xff] %v193_v14  ;;  %v144_v17 = vmul.f32 %v674_v48, %v143_v9 }
  0xae   :  { %235 = vst [vmem:[#allocation1 + $0x7] ss:$9 sm:$0xff] %v194_v15  ;;  %v153_v15 = vadd.f32 1e-06, %v138_v8 }
  0xaf   :  { %v145_v13 = vmul.f32 %v144_v17, %v909_v38 }
  0xb0   :  { %677 = vrcp.f32 %v153_v15 }
  0xb1   :  { %v147_v25 = vsel %vm146_vm8, %v909_v38, %v145_v13 }
  0xb5   :  { %v236_v30 = vld [vmem:[#allocation1] sm:$0xff] }
  0xb6   :  { %237 = vst [vmem:[#allocation1] ss:$9 sm:$0xff] %v195_v24  ;;  %253 = vperm.xlu0 %653, %v236_v30   ;;  %v298_v24 = vperm.slane %v676_v6, 7  ;;  %v678_v26 = vpop.eup %677 }
  0xb7   :  { %238 = vst [vmem:[#allocation1 + $0x1] ss:$9 sm:$0xff] %v196_v28  ;;  %v150_v28 = vsel %vm148_vm9, %v149_v27, %v147_v25  ;;  %v300_v30 = vperm.slane %v678_v26, 1  ;;  %v301_v33 = vperm.slane %v678_v26, 2  ;;  %v302_v34 = vperm.slane %v678_v26, 3 }
  0xb8   :  { %239 = vst [vmem:[#allocation1 + $0x2] ss:$9 sm:$0xff] %v197_v29  ;;  %v299_v29 = vperm.slane %v678_v26, 0  ;;  %v304_v36 = vperm.slane %v678_v26, 5  ;;  %v460_v25 = vsub.f32 1.0, %v937_v49 }
  0xb9   :  { %240 = vst [vmem:[#allocation1 + $0x3] ss:$9 sm:$0xff] %v198_v32  ;;  %v154_v32 = vadd.f32 1e-06, %v150_v28 }
  0xba   :  { %241 = vst [vmem:[#allocation1 + $0x4] ss:$9 sm:$0xff] %v199_v35  ;;  %v303_v35 = vperm.slane %v678_v26, 4 }
  0xbb   :  { %242 = vst [vmem:[#allocation1 + $0x5] ss:$9 sm:$0xff] %v200_v37  ;;  %679 = vrcp.f32 %v154_v32  ;;  %v305_v37 = vperm.slane %v678_v26, 6 }
  0xbc   :  { %243 = vst [vmem:[#allocation1 + $0x6] ss:$9 sm:$0xff] %v201_v39  ;;  %v306_v39 = vperm.slane %v678_v26, 7 }
  0xbd   :  { %244 = vst [vmem:[#allocation1 + $0x7] ss:$9 sm:$0xff] %v202_v40 }
  0xbe   :  { %163 = vperm.xlu0 %653, %v915_v43  }
  0xc1   :  { %v680_v38 = vpop.eup %679 }
  0xc2   :  { %v307_v40 = vperm.slane %v680_v38, 0  ;;  %v308_v42 = vperm.slane %v680_v38, 1  ;;  %v309_v44 = vperm.slane %v680_v38, 2  ;;  %v310_v45 = vperm.slane %v680_v38, 3 }
  0xc3   :  { %v311_v46 = vperm.slane %v680_v38, 4  ;;  %v312_v47 = vperm.slane %v680_v38, 5  ;;  %v313_v48 = vperm.slane %v680_v38, 6  ;;  %v314_v50 = vperm.slane %v680_v38, 7 }
  0xc4   :  { %v245_v52 = vld [vmem:[#allocation1] sm:$0xff] }
  0xc5   :  { %315 = vst [vmem:[#allocation1] ss:$9 sm:$0xff] %v283_v51  ;;  %256 = vperm.xlu2 %652, %v245_v52  }
  0xc6   :  { %317 = vst [vmem:[#allocation1 + $0x1] ss:$9 sm:$0xff] %v284_v54 }
  0xc7   :  { %319 = vst [vmem:[#allocation1 + $0x2] ss:$9 sm:$0xff] %v285_v57 }
  0xc8   :  { %321 = vst [vmem:[#allocation1 + $0x3] ss:$9 sm:$0xff] %v286_v59 }
  0xc9   :  { %323 = vst [vmem:[#allocation1 + $0x4] ss:$9 sm:$0xff] %v287_v60 }
  0xca   :  { %325 = vst [vmem:[#allocation1 + $0x5] ss:$9 sm:$0xff] %v288_v61  ;;  %v261_v61 = vadd.s32 4294967288, %v259_v58 }
  0xcb   :  { %327 = vst [vmem:[#allocation1 + $0x6] ss:$9 sm:$0xff] %v289_v62  ;;  %v793_v62 = vmov 1  }
  0xcc   :  { %329 = vst [vmem:[#allocation1 + $0x7] ss:$9 sm:$0xff] %v290_v3  ;;  %654 = vset.pattern.permute.xlu0 %v793_v62 }
  0xcd   :  { %449 = vperm.xlu0 %654, %v937_v49  }
  0xd3   :  { %v330_v14 = vld [vmem:[#allocation1] sm:$0xff] }
  0xd4   :  { %331 = vst [vmem:[#allocation1] ss:$9 sm:$0xff] %v291_v11  ;;  %359 = vperm.xlu1 %651, %v330_v14  }
  0xd5   :  { %332 = vst [vmem:[#allocation1 + $0x1] ss:$9 sm:$0xff] %v292_v12  ;;  %454 = vperm.xlu0 %654, %v915_v43  }
  0xd6   :  { %333 = vst [vmem:[#allocation1 + $0x2] ss:$9 sm:$0xff] %v293_v16 }
  0xd7   :  { %334 = vst [vmem:[#allocation1 + $0x3] ss:$9 sm:$0xff] %v294_v19 }
  0xd8   :  { %335 = vst [vmem:[#allocation1 + $0x4] ss:$9 sm:$0xff] %v295_v20 }
  0xd9   :  { %336 = vst [vmem:[#allocation1 + $0x5] ss:$9 sm:$0xff] %v296_v22 }
  0xda   :  { %337 = vst [vmem:[#allocation1 + $0x6] ss:$9 sm:$0xff] %v297_v23 }
  0xdb   :  { %338 = vst [vmem:[#allocation1 + $0x7] ss:$9 sm:$0xff] %v298_v24 }
  0xdd   :  { %464 = vperm.xlu0 %654, %v460_v25  }
  0xe2   :  { %v339_v31 = vld [vmem:[#allocation1] sm:$0xff] }
  0xe3   :  { %340 = vst [vmem:[#allocation1] ss:$9 sm:$0xff] %v299_v29  ;;  %362 = vperm.xlu2 %652, %v339_v31   ;;  %v461_v31 = vsub.f32 1.0, %v915_v43 }
  0xe4   :  { %341 = vst [vmem:[#allocation1 + $0x1] ss:$9 sm:$0xff] %v300_v30 }
  0xe5   :  { %342 = vst [vmem:[#allocation1 + $0x2] ss:$9 sm:$0xff] %v301_v33  ;;  %470 = vperm.xlu0 %654, %v461_v31  }
  0xe6   :  { %343 = vst [vmem:[#allocation1 + $0x3] ss:$9 sm:$0xff] %v302_v34  ;;  %v949_v34 = vshrl.u32 %v258_v56, 7  ;;  %v49_v56 = vld [vmem:[%s1009_s3] sm:$0x3] }
  0xe7   :  { %344 = vst [vmem:[#allocation1 + $0x4] ss:$9 sm:$0xff] %v303_v35 }
  0xe8   :  { %345 = vst [vmem:[#allocation1 + $0x5] ss:$9 sm:$0xff] %v304_v36  ;;  %v425_v35 = vadd.s32 3, %v949_v34  ;;  %v422_v36 = vperm.slane %v937_v49, 0 }
  0xe9   :  { %346 = vst [vmem:[#allocation1 + $0x6] ss:$9 sm:$0xff] %v305_v37  ;;  %v794_v37 = vmov 2  }
  0xea   :  { %347 = vst [vmem:[#allocation1 + $0x7] ss:$9 sm:$0xff] %v306_v39  ;;  %v429_v39 = vperm.slane %v915_v43, 0 }
  0xed   :  { %657 = vset.pattern.permute.xlu0 %v425_v35 }
  0xf1   :  { %v348_v41 = vld [vmem:[#allocation1] sm:$0xff] }
  0xf2   :  { %365 = vperm.xlu1 %651, %v348_v41   ;;  %349 = vst [vmem:[#allocation1] ss:$9 sm:$0xff] %v307_v40 }
  0xf3   :  { %350 = vst [vmem:[#allocation1 + $0x1] ss:$9 sm:$0xff] %v308_v42 }
  0xf4   :  { %351 = vst [vmem:[#allocation1 + $0x2] ss:$9 sm:$0xff] %v309_v44 }
  0xf5   :  { %352 = vst [vmem:[#allocation1 + $0x3] ss:$9 sm:$0xff] %v310_v45  ;;  %427 = vperm.xlu0 %657, %v422_v36  }
  0xf6   :  { %353 = vst [vmem:[#allocation1 + $0x4] ss:$9 sm:$0xff] %v311_v46 }
  0xf7   :  { %354 = vst [vmem:[#allocation1 + $0x5] ss:$9 sm:$0xff] %v312_v47 }
  0xf8   :  { %355 = vst [vmem:[#allocation1 + $0x6] ss:$9 sm:$0xff] %v313_v48 }
  0xf9   :  { %356 = vst [vmem:[#allocation1 + $0x7] ss:$9 sm:$0xff] %v314_v50 }
  0xfa   :  { %157 = vperm.xlu1 %651, %v937_v49  }
  0xfd   :  { %434 = vperm.xlu0 %657, %v429_v39  }
 0x100   :  { %v357_v51 = vld [vmem:[#allocation1] sm:$0xff] }
 0x101   :  { %368 = vperm.xlu2 %652, %v357_v51   ;;  %v251_v52 = vpop.permute.xlu2 %250 }
 0x102   :  { %v262_v4 = vperm.slane %v251_v52, %v261_v61  ;;  %656 = vset.pattern.permute.xlu1 %v794_v37 }
 0x105   :  { %661 = vset.pattern.permute.xlu0 %v949_v34 }
 0x109   :  { %655 = vset.pattern.permute.xlu2 %v794_v37 }
 0x10a   :  { %v248_v55 = vpop.permute.xlu1 %247 }
 0x10b   :  { %v260_v63 = vperm.slane %v248_v55, %v259_v58 }
 0x10d   :  { %v264_v8 = vsel %vm263_vm10, %v262_v4, %v260_v63 }
 0x11f   :  { %v257_v54 = vpop.permute.xlu2 %256 }
 0x120   :  { %v266_v3 = vperm.slane %v257_v54, %v261_v61 }
 0x128   :  { %v254_v57 = vpop.permute.xlu0 %253 }
 0x129   :  { %v265_v53 = vperm.slane %v254_v57, %v259_v58 }
 0x12b   :  { %v267_v5 = vsel %vm263_vm10, %v266_v3, %v265_v53 }
 0x12c   :  { %v269_v11 = vsel %vm268_vm11, %v267_v5, %v264_v8 }
 0x12d   :  { %v270_v19 = vrot.slane %v269_v11, 1 }
 0x130   :  { %v164_v6 = vpop.permute.xlu0 %163 }
 0x131   :  { %v166_v15 = vperm.slane %v164_v6, 0  ;;  %v506_v6 = vadd.s32 8, %v949_v34 }
 0x133   :  { %v274_v13 = vmul.f32 %v270_v19, %v166_v15 }
 0x13d   :  { %v363_v59 = vpop.permute.xlu2 %362 }
 0x13e   :  { %v371_v14 = vperm.slane %v363_v59, %v261_v61 }
 0x13f   :  { %v450_v51 = vpop.permute.xlu0 %449 }
 0x146   :  { %v360_v60 = vpop.permute.xlu1 %359 }
 0x147   :  { %v370_v9 = vperm.slane %v360_v60, %v259_v58  ;;  %v455_v52 = vpop.permute.xlu0 %454 }
 0x148   :  { %v457_v25 = vperm.slane %v455_v52, 0 }
 0x149   :  { %v372_v20 = vsel %vm263_vm10, %v371_v14, %v370_v9  ;;  %v452_v9 = vperm.slane %v450_v51, 0 }
 0x14f   :  { %v465_v54 = vpop.permute.xlu0 %464 }
 0x150   :  { %v467_v15 = vperm.slane %v465_v54, 0 }
 0x157   :  { %v471_v55 = vpop.permute.xlu0 %470 }
 0x15b   :  { %v369_v7 = vpop.permute.xlu2 %368 }
 0x15c   :  { %v374_v16 = vperm.slane %v369_v7, %v261_v61  ;;  %v50_v61 = vld [vmem:[%s1009_s3 + $0x2] sm:$0x3] }
 0x164   :  { %v366_v12 = vpop.permute.xlu1 %365 }
 0x165   :  { %v373_v17 = vperm.slane %v366_v12, %v259_v58  ;;  %v51_v12 = vld [vmem:[%s1010_s4] sm:$0x1] }
 0x167   :  { %v375_v22 = vsel %vm263_vm10, %v374_v16, %v373_v17  ;;  %v428_v57 = vpop.permute.xlu0 %427  ;;  %v458_v17 = vmul.f32 %v452_v9, %v51_v12 }
 0x168   :  { %v376_v23 = vsel %vm268_vm11, %v375_v22, %v372_v20  ;;  %v436_v58 = vmul.f32 %v428_v57, %v49_v56  ;;  %v550_v56 = vperm.slane %v868_v10, 1 }
 0x169   :  { %v377_v24 = vrot.slane %v376_v23, 1 }
 0x16a   :  { %v438_v59 = vsub.f32 1.0, %v436_v58 }
 0x16b   :  { %v381_v26 = vmul.f32 %v377_v24, %v274_v13 }
 0x16c   :  { %v158_v27 = vpop.permute.xlu1 %157  ;;  %v442_v60 = vrot.slane %v438_v59, 1 }
 0x16d   :  { %v160_v28 = vperm.slane %v158_v27, 0  ;;  %386 = vst [vmem:[#allocation1 + $0x1] ss:$9 sm:$0xff] %v381_v26  ;;  %v52_v27 = vld [vmem:[%s1010_s4 + $0x1] sm:$0x1] }
 0x16f   :  { %v273_v29 = vmul.f32 %v269_v11, %v160_v28  ;;  %v435_v53 = vpop.permute.xlu0 %434 }
 0x170   :  { %v437_v62 = vmul.f32 %v435_v53, %v50_v61  ;;  %v568_v61 = vperm.slane %v868_v10, 2 }
 0x171   :  { %v380_v30 = vmul.f32 %v376_v23, %v273_v29  ;;  %v459_v29 = vmul.f32 %v457_v25, %v52_v27 }
 0x172   :  { %v439_v63 = vsub.f32 1.0, %v437_v62 }
 0x173   :  { %384 = vst [vmem:[#allocation1] ss:$9 sm:$0xff] %v380_v30 }
 0x174   :  { %v443_v4 = vrot.slane %v439_v63, 1 }
 0x176   :  { %v447_v5 = vmul.f32 %v443_v4, %v439_v63 }
 0x178   :  { %585 = vst.msk [vmem:[#allocation8 + $0x1] sm:$0x1] %vm581_vm13, %v447_v5  ;;  %v536_v39 = vperm.slane %v447_v5, 0 }
 0x17a   :  { %v387_v32 = vld [vmem:[#allocation1] sm:$0xff] }
 0x17b   :  { %v390_v33 = vsel %vm389_vm12, %v387_v32, -inf }
 0x17c   :  { %391 = vmax.xlane.f32.xlu2 %v390_v33 }
 0x194   :  { %479 = vperm.xlu2 %655, %v937_v49  }
 0x19c   :  { %659 = vset.pattern.permute.xlu2 %v949_v34 }
 0x1ef   :  { %v392_v38 = vpop.xlane.xlu2 %391 }
 0x1f0   :  { %v394_v40 = vperm.slane %v392_v38, 0  ;;  %v395_v41 = vperm.slane %v392_v38, 1 }
 0x1f2   :  { %v398_v42 = vsub.f32 %v380_v30, %v394_v40  ;;  %v399_v44 = vsub.f32 %v381_v26, %v395_v41  ;;  %v473_v26 = vperm.slane %v471_v55, 0 }
 0x1f4   :  { %v400_v45 = vmul.f32 1.442695, %v398_v42  ;;  %v402_v46 = vmul.f32 1.442695, %v399_v44  ;;  %v567_v42 = vperm.slane %v849_v0, 2 }
 0x1f6   :  { %681 = vpow2.f32 %v400_v45 }
 0x1f7   :  { %683 = vpow2.f32 %v402_v46  ;;  %v480_v14 = vpop.permute.xlu2 %479 }
 0x1f8   :  { %v482_v20 = vperm.slane %v480_v14, 0 }
 0x1fc   :  { %v682_v47 = vpop.eup %681 }
 0x1fd   :  { %v684_v48 = vpop.eup %683  ;;  %406 = vst [vmem:[#allocation1] ss:$9 sm:$0xff] %v682_v47 }
 0x1fe   :  { %408 = vst [vmem:[#allocation1 + $0x1] ss:$9 sm:$0xff] %v684_v48 }
 0x205   :  { %v409_v49 = vld [vmem:[#allocation1] sm:$0xff] }
 0x206   :  { %v411_v50 = vsel %vm389_vm12, %v409_v49, 0.0 }
 0x207   :  { %412 = vadd.xlane.f32.xlu1 %v411_v50 }
 0x220   :  { %484 = vperm.xlu1 %656, %v915_v43   ;;  %v966_v43 = vmul.f32 %v442_v60, %v438_v59 }
 0x222   :  { %584 = vst.msk [vmem:[#allocation8] sm:$0x1] %vm581_vm13, %v966_v43  ;;  %v523_v3 = vperm.slane %v966_v43, 0 }
 0x228   :  { %658 = vset.pattern.permute.xlu1 %v949_v34 }
 0x230   :  { %528 = vperm.xlu1 %658, %v523_v3  }
 0x238   :  { %660 = vset.pattern.permute.xlu1 %v506_v6 }
 0x27a   :  { %v413_v7 = vpop.xlane.xlu1 %412 }
 0x27b   :  { %685 = vrcp.f32 %v413_v7 }
 0x281   :  { %v686_v8 = vpop.eup %685 }
 0x282   :  { %v416_v11 = vperm.slane %v686_v8, 0  ;;  %v417_v22 = vperm.slane %v686_v8, 1 }
 0x284   :  { %v420_v16 = vmul.f32 %v682_v47, %v416_v11  ;;  %v421_v24 = vmul.f32 %v684_v48, %v417_v22 }
 0x286   :  { %v474_v19 = vmul.f32 %v467_v15, %v420_v16  ;;  %v475_v28 = vmul.f32 %v473_v26, %v421_v24 }
 0x288   :  { %v476_v23 = vadd.f32 %v474_v19, %v458_v17  ;;  %v477_v31 = vadd.f32 %v475_v28, %v459_v29 }
 0x28a   :  { %v488_v13 = vmul.f32 %v482_v20, %v476_v23 }
 0x28c   :  { %582 = vst.msk [vmem:[#allocation6] sm:$0x1] %vm581_vm13, %v488_v13 }
 0x28d   :  { %492 = vst [vmem:[#allocation1] ss:$9 sm:$0xff] %v488_v13 }
 0x292   :  { %v485_v30 = vpop.permute.xlu1 %484 }
 0x293   :  { %v487_v32 = vperm.slane %v485_v30, 0 }
 0x295   :  { %v489_v33 = vmul.f32 %v487_v32, %v477_v31 }
 0x297   :  { %583 = vst.msk [vmem:[#allocation6 + $0x1] sm:$0x1] %vm581_vm13, %v489_v33 }
 0x298   :  { %494 = vst [vmem:[#allocation1 + $0x1] ss:$9 sm:$0xff] %v489_v33  ;;  %611 = dma.vmem_to_hbm [thread:$0]  %s604_s23, 32, %s606_s21, [#allocation7], %s796_s24, %s796_s24, %s797_s25  }
 0x299   :  { %624 = dma.vmem_to_hbm [thread:$0]  %s617_s9, 32, %s619_s28, [#allocation7], %s796_s24, %s796_s24, %s797_s25  }
 0x29f   :  { %v495_v35 = vld [vmem:[#allocation1] sm:$0xff] }
 0x2a0   :  { %v510_v36 = vperm.slane %v495_v35, 1  ;;  %v497_v37 = vperm.slane %v495_v35, 0 }
 0x2a2   :  { %515 = vperm.xlu0 %661, %v510_v36   ;;  %502 = vperm.xlu2 %659, %v497_v37   ;;  %v529_v41 = vpop.permute.xlu1 %528 }
 0x2a3   :  { %508 = vperm.xlu1 %660, %v497_v37  }
 0x2aa   :  { %664 = vset.pattern.permute.xlu0 %v506_v6  ;;  %662 = vset.pattern.permute.xlu2 %v506_v6 }
 0x2ab   :  { %663 = vset.pattern.permute.xlu1 %v949_v34  ;;  %v549_v34 = vperm.slane %v849_v0, 1 }
 0x2b2   :  { %521 = vperm.xlu2 %662, %v510_v36   ;;  %547 = vperm.xlu0 %664, %v536_v39  }
 0x2b3   :  { %541 = vperm.xlu1 %663, %v536_v39  }
 0x2ba   :  { %534 = vperm.xlu2 %662, %v523_v3  }
 0x2fc   :  { %v503_v38 = vpop.permute.xlu2 %502 }
 0x2fd   :  { %v551_v40 = vmul.f32 %v549_v34, %v503_v38  ;;  %v569_v46 = vmul.f32 %v567_v42, %v503_v38 }
 0x2ff   :  { %v555_v44 = vsub.f32 1.0, %v551_v40 }
 0x301   :  { %v559_v45 = vmul.f32 %v555_v44, %v529_v41 }
 0x303   :  { %v563_v47 = vmul.f32 %v559_v45, %v851_v1 }
 0x305   :  { %v573_v48 = vadd.f32 %v569_v46, %v563_v47 }
 0x307   :  { %577 = vst.msk [vmem:[#allocation5] sm:$0xff] %vm59_vm1, %v573_v48 }
 0x30c   :  { %v522_v49 = vpop.permute.xlu2 %521 }
 0x30d   :  { %v554_v60 = vmul.f32 %v550_v56, %v522_v49  ;;  %v572_v5 = vmul.f32 %v568_v61, %v522_v49 }
 0x30f   :  { %v558_v43 = vsub.f32 1.0, %v554_v60 }
 0x314   :  { %v535_v54 = vpop.permute.xlu2 %534  ;;  %v516_v0 = vpop.permute.xlu0 %515 }
 0x315   :  { %v509_v50 = vpop.permute.xlu1 %508  ;;  %v553_v1 = vmul.f32 %v550_v56, %v516_v0 }
 0x316   :  { %v552_v51 = vmul.f32 %v549_v34, %v509_v50  ;;  %v570_v58 = vmul.f32 %v567_v42, %v509_v50 }
 0x317   :  { %v557_v53 = vsub.f32 1.0, %v553_v1 }
 0x318   :  { %v556_v52 = vsub.f32 1.0, %v552_v51 }
 0x31a   :  { %v560_v55 = vmul.f32 %v556_v52, %v535_v54 }
 0x31c   :  { %v564_v57 = vmul.f32 %v560_v55, %v853_v2  ;;  %v571_v2 = vmul.f32 %v568_v61, %v516_v0 }
 0x31e   :  { %v574_v59 = vadd.f32 %v570_v58, %v564_v57 }
 0x320   :  { %578 = vst.msk [vmem:[#allocation5 + $0x8] sm:$0xff] %vm59_vm1, %v574_v59 }
 0x324   :  { %v548_v62 = vpop.permute.xlu0 %547 }
 0x325   :  { %v542_v63 = vpop.permute.xlu1 %541  ;;  %v562_v3 = vmul.f32 %v558_v43, %v548_v62 }
 0x326   :  { %v561_v4 = vmul.f32 %v557_v53, %v542_v63 }
 0x327   :  { %v566_v6 = vmul.f32 %v562_v3, %v883_v21 }
 0x328   :  { %v565_v7 = vmul.f32 %v561_v4, %v878_v18 }
 0x329   :  { %v576_v8 = vadd.f32 %v572_v5, %v566_v6 }
 0x32a   :  { %v575_v10 = vadd.f32 %v571_v2, %v565_v7 }
 0x32b   :  { %580 = vst.msk [vmem:[#allocation5 + $0x18] sm:$0xff] %vm59_vm1, %v576_v8 }
 0x32c   :  { %579 = vst.msk [vmem:[#allocation5 + $0x10] sm:$0xff] %vm59_vm1, %v575_v10 }
 0x32d   :  { %598 = dma.vmem_to_hbm [thread:$0]  %s591_s7, 512, %s593_s1, [#allocation4], %s790_s29, %s790_s29, %s791_s30  }
 0x32e   :  { %785 = dma.done.wait [#allocation4], 512  }
 0x32f   :  { %786 = vsyncadd [#allocation4], 4294966784 }
 0x330   :  { %787 = dma.done.wait [#allocation7], 64  }
 0x331   :  { %788 = vsyncadd [#allocation7], 4294967232 }
 0x332   :  { %637 = vsyncpa [#allocation3], 1 }
 0x333   :  { %638 = vsyncpa [#allocation4], 1 }
 0x334   :  { %639 = vsyncpa [#allocation7], 1 }

</bundles_post_ra>
